<compile_context>
chip_gen: v6e
topology: v6e:2x2x1
jax: 0.10.0
libtpu: 0.0.40
codegen_flags: <defaults>
</compile_context>

<pallas_src>
import functools

import jax
import jax.numpy as jnp
from jax.experimental import pallas as pl
from jax.experimental.pallas import tpu as pltpu


_LANE = 128      # TPU lane width (last-dim vector width), all generations.
_MAX_TM = 1024   # vreg-pressure ceiling: a (32, tm) f32 activation is 4*tm/128
                 # vregs; two live activations at tm=1024 already fill the
                 # 64-entry register file, so larger tiles go spill-bound.


def _bbnn_kernel(x_ref, *refs, n_mid):
    """Whole MLP hot path; activations are (features, batch_tile).

    refs layout: w_in (H, n_in), b_in (H, 1),
                 [w_mid (n_mid, H, H), b_mid (n_mid, H, 1)]   (only if n_mid > 0),
                 w_out (n_out, H), b_out (n_out, 1),
                 out_ref (n_out, tm)
    Weights are in native PyTorch nn.Linear (out_features, in_features) layout,
    so every layer is h_next = W @ h + b with the batch on the lane axis.
    """
    out_ref = refs[-1]
    w_in_ref, b_in_ref = refs[0], refs[1]
    if n_mid > 0:
        w_mid_ref, b_mid_ref = refs[2], refs[3]
        w_out_ref, b_out_ref = refs[4], refs[5]
    else:
        w_out_ref, b_out_ref = refs[2], refs[3]

    x = x_ref[...]                       # (n_in, tm): lane-dense load.
    n_in = x.shape[0]
    w_in = w_in_ref[...]                 # (H, n_in)
    b_in = b_in_ref[...]                 # (H, 1) -> broadcasts along lanes.

    # ---- Layer 0: Linear(n_in, H) + tanh ---------------------------------
    # K = n_in is tiny for a PINN (1-4), so the contraction is done as VPU
    # broadcast-FMAs on otherwise-idle VALU slots instead of paying an MXU
    # weight-push + result-FIFO pop on the critical path of every grid step.
    if n_in <= 8:
        h = b_in
        for i in range(n_in):
            # (H, 1) * (1, tm) -> (H, tm); pure VPU, exact f32.
            h = h + w_in[:, i:i + 1] * x[i:i + 1, :]
    else:
        h = jnp.dot(w_in, x, preferred_element_type=jnp.float32) + b_in
    h = jnp.tanh(h)                      # EUP; (H, tm)

    # ---- Hidden layers: (N_LAYERS-1) x [Linear(H, H) + tanh] -------------
    # Python-unrolled (full LLO scheduler visibility); weights live in one
    # stacked resident VMEM block, statically indexed per layer.
    for l in range(n_mid):
        w = w_mid_ref[l]                 # (H, H)
        b = b_mid_ref[l]                 # (H, 1)
        # MXU matmul with f32 accumulation; K = H = 32 keeps the default f32
        # MXU path well within the 1e-5 tolerance used below.
        h = jnp.tanh(jnp.dot(w, h, preferred_element_type=jnp.float32) + b)

    # ---- Output layer: Linear(H, n_out), no activation --------------------
    out = jnp.dot(w_out_ref[...], h, preferred_element_type=jnp.float32) + b_out_ref[...]
    out_ref[...] = out.astype(out_ref.dtype)   # (n_out, tm): lane-dense store.


def _pick_tm(batch, max_tm=_MAX_TM):
    """Batch tile on the lane axis.

    Largest multiple of 128 (v5e lane width; 256-alignment buys nothing here)
    that (a) stays under the vreg-pressure ceiling max_tm and (b) yields an
    even, >= 2 grid-step count whenever the batch spans more than one lane
    tile, so both v7x TensorCores get balanced work and the ~0.35us fixed
    per-grid-step overhead is amortized over big tiles.
    """
    b_tiles = pl.cdiv(batch, _LANE)
    if b_tiles <= 1:
        return _LANE
    max_tiles = max(1, max_tm // _LANE)
    steps = max(2, 2 * pl.cdiv(b_tiles, 2 * max_tiles))   # even, >= 2
    return pl.cdiv(b_tiles, steps) * _LANE


def bbnn_forward_fm(x_t, weights, biases, *, tm=None):
    """Feature-major forward pass (preferred, transpose/pad/slice free).

    x_t:     (n_input, batch) float32 — batch on the trailing (lane) axis.
    weights: list of (out_features, in_features) arrays (PyTorch layout).
    biases:  list of (out_features,) arrays.
    returns  (n_output, batch).
    """
    n_in, B = x_t.shape
    assert len(weights) >= 2 and len(weights) == len(biases)
    H = weights[0].shape[0]
    n_out = weights[-1].shape[0]
    n_mid = len(weights) - 2

    if tm is None:
        tm = _pick_tm(B)
    grid = (pl.cdiv(B, tm),)   # ragged last block: OOB stores are masked.

    # Constant index maps keep every parameter block resident in VMEM across
    # grid steps; hidden-layer params are stacked so the call carries 6 input
    # specs regardless of depth.  (In a real PINN loop, store them pre-stacked.)
    args = [x_t, weights[0], biases[0].reshape(H, 1)]
    in_specs = [
        pl.BlockSpec((n_in, tm), lambda i: (0, i)),
        pl.BlockSpec((H, n_in), lambda i: (0, 0)),
        pl.BlockSpec((H, 1), lambda i: (0, 0)),
    ]
    if n_mid > 0:
        w_mid = jnp.stack(weights[1:-1])                             # (n_mid, H, H)
        b_mid = jnp.stack([b.reshape(H, 1) for b in biases[1:-1]])   # (n_mid, H, 1)
        args += [w_mid, b_mid]
        in_specs += [
            pl.BlockSpec((n_mid, H, H), lambda i: (0, 0, 0)),
            pl.BlockSpec((n_mid, H, 1), lambda i: (0, 0, 0)),
        ]
    args += [weights[-1], biases[-1].reshape(n_out, 1)]
    in_specs += [
        pl.BlockSpec((n_out, H), lambda i: (0, 0)),
        pl.BlockSpec((n_out, 1), lambda i: (0, 0)),
    ]

    out_specs = pl.BlockSpec((n_out, tm), lambda i: (0, i))
    kernel = functools.partial(_bbnn_kernel, n_mid=n_mid)

    return pl.pallas_call(
        kernel,
        out_shape=jax.ShapeDtypeStruct((n_out, B), x_t.dtype),
        grid_spec=pltpu.PrefetchScalarGridSpec(
            num_scalar_prefetch=0,
            grid=grid,
            in_specs=in_specs,
            out_specs=out_specs,
        ),
        compiler_params=pltpu.CompilerParams(
            dimension_semantics=("parallel",),   # batch steps shard across v7x TCs
        ),
    )(*args)


def bbnn_forward(x, weights, biases, *, tm=None):
    """PyTorch-layout forward pass: (batch, n_input) -> (batch, n_output).

    Compatibility shim around the feature-major kernel: the two transposes are
    tiny XLA ops but still extra HBM passes over x / the output — keep
    collocation points feature-major in the PINN pipeline and call
    bbnn_forward_fm directly to avoid them.
    """
    return bbnn_forward_fm(x.T, weights, biases, tm=tm).T


def bbnn_loss(x_obs, y_obs, weights, biases):
    """Module's loss_func: MSE on the forward pass (plain JAX; the reduction
    is not worth a dedicated kernel)."""
    yp = bbnn_forward(x_obs, weights, biases)
    return jnp.mean((yp - y_obs) ** 2)


def init_bbnn_params(key, n_input, n_output, n_hidden, n_layers):
    """nn.Linear-style init: U(-1/sqrt(fan_in), 1/sqrt(fan_in)), (out, in) layout."""
    dims = [n_input] + [n_hidden] * n_layers + [n_output]
    weights, biases = [], []
    for fan_in, fan_out in zip(dims[:-1], dims[1:]):
        key, kw, kb = jax.random.split(key, 3)
        bound = 1.0 / jnp.sqrt(jnp.float32(fan_in))
        w = jax.random.uniform(kw, (fan_out, fan_in), jnp.float32, -bound, bound)
        b = jax.random.uniform(kb, (fan_out,), jnp.float32, -bound, bound)
        weights.append(w)
        biases.append(b)
    return weights, biases


def bbnn_reference(x, weights, biases):
    """Plain-JAX reference of the same forward pass (PyTorch semantics)."""
    h = x
    for l, (w, b) in enumerate(zip(weights, biases)):
        h = h @ w.T + b
        if l < len(weights) - 1:
            h = jnp.tanh(h)
    return h


if __name__ == "__main__":
    # sdof_osa-style PINN MLP shapes.
    N_INPUT, N_OUTPUT, N_HIDDEN, N_LAYERS = 2, 2, 32, 3

    key = jax.random.PRNGKey(0)
    key, kp = jax.random.split(key)
    weights, biases = init_bbnn_params(kp, N_INPUT, N_OUTPUT, N_HIDDEN, N_LAYERS)

    # Case 1: PyTorch-layout entry, multi-step grid with a ragged last block
    # (B=384 -> tm=256 -> 2 steps, second block half-masked).  Exercises the
    # no-pad / masked-store path and the batch-major shim.
    key, kx = jax.random.split(key)
    x = jax.random.normal(kx, (384, N_INPUT), jnp.float32)
    y = jax.block_until_ready(bbnn_forward(x, weights, biases))
    y_ref = bbnn_reference(x, weights, biases)
    assert y.shape == (384, N_OUTPUT)
    assert jnp.allclose(y, y_ref, atol=1e-5, rtol=1e-5)

    # Case 2: feature-major fast path (no wrapper layout ops at all).
    key, kx2 = jax.random.split(key)
    x2_t = jax.random.normal(kx2, (N_INPUT, 512), jnp.float32)
    y2_t = jax.block_until_ready(bbnn_forward_fm(x2_t, weights, biases))
    y2_ref = bbnn_reference(x2_t.T, weights, biases)
    assert y2_t.shape == (N_OUTPUT, 512)
    assert jnp.allclose(y2_t.T, y2_ref, atol=1e-5, rtol=1e-5)

    # Case 3: tiny ragged batch (single grid step, mostly masked).
    key, kx3 = jax.random.split(key)
    x3 = jax.random.normal(kx3, (100, N_INPUT), jnp.float32)
    y3 = jax.block_until_ready(bbnn_forward(x3, weights, biases))
    assert y3.shape == (100, N_OUTPUT)
    assert jnp.allclose(y3, bbnn_reference(x3, weights, biases), atol=1e-5, rtol=1e-5)

    print("KERNEL_OK")
</pallas_src>

<mosaic_0001>
module attributes {stable_mosaic.version = 11 : i64} {
  func.func @_bbnn_kernel(%arg0: i32, %arg1: memref<2x256xf32, #tpu.memory_space<vmem>>, %arg2: memref<32x2xf32, #tpu.memory_space<vmem>>, %arg3: memref<32x1xf32, #tpu.memory_space<vmem>>, %arg4: memref<2x32x32xf32, #tpu.memory_space<vmem>>, %arg5: memref<2x32x1xf32, #tpu.memory_space<vmem>>, %arg6: memref<2x32xf32, #tpu.memory_space<vmem>>, %arg7: memref<2x1xf32, #tpu.memory_space<vmem>>, %arg8: memref<2x256xf32, #tpu.memory_space<vmem>>) attributes {dimension_semantics = [#tpu.dimension_semantics<parallel>], iteration_bounds = array<i64: 2>, scalar_prefetch = 0 : i64, scratch_operands = 0 : i64, tpu.core_type = #tpu.core_type<tc>, window_params = [{transform_indices = @transform_0, window_bounds = array<i64: 2, 256>}, {pipeline_mode = #tpu.pipeline_mode<synchronous>, transform_indices = @transform_1, window_bounds = array<i64: 32, 2>}, {pipeline_mode = #tpu.pipeline_mode<synchronous>, transform_indices = @transform_2, window_bounds = array<i64: 32, 1>}, {pipeline_mode = #tpu.pipeline_mode<synchronous>, transform_indices = @transform_3, window_bounds = array<i64: 2, 32, 32>}, {pipeline_mode = #tpu.pipeline_mode<synchronous>, transform_indices = @transform_4, window_bounds = array<i64: 2, 32, 1>}, {pipeline_mode = #tpu.pipeline_mode<synchronous>, transform_indices = @transform_5, window_bounds = array<i64: 2, 32>}, {pipeline_mode = #tpu.pipeline_mode<synchronous>, transform_indices = @transform_6, window_bounds = array<i64: 2, 1>}, {transform_indices = @transform_7, window_bounds = array<i64: 2, 256>}]} {
    %c0 = arith.constant 0 : index
    %c0_0 = arith.constant 0 : index
    %0 = vector.load %arg1[%c0, %c0_0] : memref<2x256xf32, #tpu.memory_space<vmem>>, vector<2x256xf32>
    %c0_1 = arith.constant 0 : index
    %c0_2 = arith.constant 0 : index
    %1 = vector.load %arg2[%c0_1, %c0_2] : memref<32x2xf32, #tpu.memory_space<vmem>>, vector<32x2xf32>
    %c0_3 = arith.constant 0 : index
    %c0_4 = arith.constant 0 : index
    %2 = vector.load %arg3[%c0_3, %c0_4] : memref<32x1xf32, #tpu.memory_space<vmem>>, vector<32x1xf32>
    %3 = vector.extract_strided_slice %1 {offsets = [0, 0], sizes = [32, 1], strides = [1, 1]} : vector<32x2xf32> to vector<32x1xf32>
    %4 = vector.extract_strided_slice %0 {offsets = [0, 0], sizes = [1, 256], strides = [1, 1]} : vector<2x256xf32> to vector<1x256xf32>
    %5 = vector.broadcast %3 : vector<32x1xf32> to vector<32x256xf32>
    %6 = vector.broadcast %4 : vector<1x256xf32> to vector<32x256xf32>
    %7 = arith.mulf %5, %6 : vector<32x256xf32>
    %8 = vector.broadcast %2 : vector<32x1xf32> to vector<32x256xf32>
    %9 = arith.addf %8, %7 : vector<32x256xf32>
    %10 = vector.extract_strided_slice %1 {offsets = [0, 1], sizes = [32, 1], strides = [1, 1]} : vector<32x2xf32> to vector<32x1xf32>
    %11 = vector.extract_strided_slice %0 {offsets = [1, 0], sizes = [1, 256], strides = [1, 1]} : vector<2x256xf32> to vector<1x256xf32>
    %12 = vector.broadcast %10 : vector<32x1xf32> to vector<32x256xf32>
    %13 = vector.broadcast %11 : vector<1x256xf32> to vector<32x256xf32>
    %14 = arith.mulf %12, %13 : vector<32x256xf32>
    %15 = arith.addf %9, %14 : vector<32x256xf32>
    %16 = math.tanh %15 : vector<32x256xf32>
    %c0_5 = arith.constant 0 : index
    %c0_6 = arith.constant 0 : index
    %c0_7 = arith.constant 0 : index
    %17 = vector.load %arg4[%c0_5, %c0_6, %c0_7] : memref<2x32x32xf32, #tpu.memory_space<vmem>>, vector<1x32x32xf32>
    %18 = vector.shape_cast %17 : vector<1x32x32xf32> to vector<32x32xf32>
    %c0_8 = arith.constant 0 : index
    %c0_9 = arith.constant 0 : index
    %c0_10 = arith.constant 0 : index
    %19 = vector.load %arg5[%c0_8, %c0_9, %c0_10] : memref<2x32x1xf32, #tpu.memory_space<vmem>>, vector<1x32x1xf32>
    %20 = vector.shape_cast %19 : vector<1x32x1xf32> to vector<32x1xf32>
    %cst = arith.constant dense<0.000000e+00> : vector<32x256xf32>
    %21 = tpu.matmul %18, %16, %cst {dimension_numbers = #tpu.dot_dimension_numbers<[1], [0], [0], [1], [0, 0, 1, 1], [], []>} : vector<32x32xf32>, vector<32x256xf32>, vector<32x256xf32> -> vector<32x256xf32>
    %22 = vector.broadcast %20 : vector<32x1xf32> to vector<32x256xf32>
    %23 = arith.addf %21, %22 : vector<32x256xf32>
    %24 = math.tanh %23 : vector<32x256xf32>
    %c1 = arith.constant 1 : index
    %c0_11 = arith.constant 0 : index
    %c0_12 = arith.constant 0 : index
    %25 = vector.load %arg4[%c1, %c0_11, %c0_12] : memref<2x32x32xf32, #tpu.memory_space<vmem>>, vector<1x32x32xf32>
    %26 = vector.shape_cast %25 : vector<1x32x32xf32> to vector<32x32xf32>
    %c1_13 = arith.constant 1 : index
    %c0_14 = arith.constant 0 : index
    %c0_15 = arith.constant 0 : index
    %27 = vector.load %arg5[%c1_13, %c0_14, %c0_15] : memref<2x32x1xf32, #tpu.memory_space<vmem>>, vector<1x32x1xf32>
    %28 = vector.shape_cast %27 : vector<1x32x1xf32> to vector<32x1xf32>
    %cst_16 = arith.constant dense<0.000000e+00> : vector<32x256xf32>
    %29 = tpu.matmul %26, %24, %cst_16 {dimension_numbers = #tpu.dot_dimension_numbers<[1], [0], [0], [1], [0, 0, 1, 1], [], []>} : vector<32x32xf32>, vector<32x256xf32>, vector<32x256xf32> -> vector<32x256xf32>
    %30 = vector.broadcast %28 : vector<32x1xf32> to vector<32x256xf32>
    %31 = arith.addf %29, %30 : vector<32x256xf32>
    %32 = math.tanh %31 : vector<32x256xf32>
    %c0_17 = arith.constant 0 : index
    %c0_18 = arith.constant 0 : index
    %33 = vector.load %arg6[%c0_17, %c0_18] : memref<2x32xf32, #tpu.memory_space<vmem>>, vector<2x32xf32>
    %cst_19 = arith.constant dense<0.000000e+00> : vector<2x256xf32>
    %34 = tpu.matmul %33, %32, %cst_19 {dimension_numbers = #tpu.dot_dimension_numbers<[1], [0], [0], [1], [0, 0, 1, 1], [], []>} : vector<2x32xf32>, vector<32x256xf32>, vector<2x256xf32> -> vector<2x256xf32>
    %c0_20 = arith.constant 0 : index
    %c0_21 = arith.constant 0 : index
    %35 = vector.load %arg7[%c0_20, %c0_21] : memref<2x1xf32, #tpu.memory_space<vmem>>, vector<2x1xf32>
    %36 = vector.broadcast %35 : vector<2x1xf32> to vector<2x256xf32>
    %37 = arith.addf %34, %36 : vector<2x256xf32>
    %c0_22 = arith.constant 0 : index
    %c0_23 = arith.constant 0 : index
    %38 = vector.load %arg8[%c0_22, %c0_23] : memref<2x256xf32, #tpu.memory_space<vmem>>, vector<2x256xf32>
    tpu.vector_store %arg8[%c0_22, %c0_23], %37 {strides = array<i32>} : memref<2x256xf32, #tpu.memory_space<vmem>>, vector<2x256xf32>,
    return
  }
  func.func @transform_0(%arg0: i32) -> (i32, i32) {
    %c0_i32 = arith.constant 0 : i32
    %c0_i32_0 = arith.constant 0 : i32
    return %c0_i32, %arg0 : i32, i32
  }
  func.func @transform_1(%arg0: i32) -> (i32, i32) {
    %c0_i32 = arith.constant 0 : i32
    %c0_i32_0 = arith.constant 0 : i32
    %c0_i32_1 = arith.constant 0 : i32
    return %c0_i32, %c0_i32_0 : i32, i32
  }
  func.func @transform_2(%arg0: i32) -> (i32, i32) {
    %c0_i32 = arith.constant 0 : i32
    %c0_i32_0 = arith.constant 0 : i32
    %c0_i32_1 = arith.constant 0 : i32
    return %c0_i32, %c0_i32_0 : i32, i32
  }
  func.func @transform_3(%arg0: i32) -> (i32, i32, i32) {
    %c0_i32 = arith.constant 0 : i32
    %c0_i32_0 = arith.constant 0 : i32
    %c0_i32_1 = arith.constant 0 : i32
    %c0_i32_2 = arith.constant 0 : i32
    return %c0_i32, %c0_i32_0, %c0_i32_1 : i32, i32, i32
  }
  func.func @transform_4(%arg0: i32) -> (i32, i32, i32) {
    %c0_i32 = arith.constant 0 : i32
    %c0_i32_0 = arith.constant 0 : i32
    %c0_i32_1 = arith.constant 0 : i32
    %c0_i32_2 = arith.constant 0 : i32
    return %c0_i32, %c0_i32_0, %c0_i32_1 : i32, i32, i32
  }
  func.func @transform_5(%arg0: i32) -> (i32, i32) {
    %c0_i32 = arith.constant 0 : i32
    %c0_i32_0 = arith.constant 0 : i32
    %c0_i32_1 = arith.constant 0 : i32
    return %c0_i32, %c0_i32_0 : i32, i32
  }
  func.func @transform_6(%arg0: i32) -> (i32, i32) {
    %c0_i32 = arith.constant 0 : i32
    %c0_i32_0 = arith.constant 0 : i32
    %c0_i32_1 = arith.constant 0 : i32
    return %c0_i32, %c0_i32_0 : i32, i32
  }
  func.func @transform_7(%arg0: i32) -> (i32, i32) {
    %c0_i32 = arith.constant 0 : i32
    %c0_i32_0 = arith.constant 0 : i32
    return %c0_i32, %arg0 : i32, i32
  }
}

</mosaic_0001>

<bundles_post_ra>
// kernel: tpu_custom_call.1
= control target key start
LH: loop header
LB: loop body
LE: loop exit
PB: predicated region body
PF: predicated region fallthrough
CT: control target
= control target key end

     0   :  { %12 = vsyncpa [#allocation3], 0  ;;  %s1332_s0 = inlined_call_operand.vmem [shape: f32[2,384], index: 0, kind: input, shape index: {}]   ;;  %s1333_s1 = inlined_call_operand.vmem [shape: f32[32,2], index: 1, kind: input, shape index: {}]   ;;  %s1334_s2 = inlined_call_operand.vmem [shape: f32[32,1], index: 2, kind: input, shape index: {}]   ;;  %s1335_s3 = inlined_call_operand.vmem [shape: f32[2,32,32], index: 3, kind: input, shape index: {}]   ;;  %s1336_s4 = inlined_call_operand.vmem [shape: f32[2,32,1], index: 4, kind: input, shape index: {}]   ;;  %s1337_s5 = inlined_call_operand.vmem [shape: f32[2,32], index: 5, kind: input, shape index: {}]   ;;  %s1338_s6 = inlined_call_operand.vmem [shape: f32[2,1], index: 6, kind: input, shape index: {}]   ;;  %s1339_s7 = inlined_call_operand.hbm [shape: f32[2,384], index: 7, kind: output, shape index: {}]  }
   0x1   :  { %14 = vsyncpa [#allocation3 + $0x1], 0  ;;  %s1132_s24 = smov 0   ;;  %s1134_s25 = smov 0  }
   0x2   :  { %s1136_s26 = smov 0   ;;  %s1138_s27 = smov 0  }
   0x3 LB: > { %s1153_s28 = sadd.s32 4294967295, %s1086_s27   ;;  %s896_s29 = sadd.s32 4294967294, %s1086_s27   ;;  %s1086_s27 = sphi %s1138_s27, %s1345_s27   ;;  %s1082_s26 = sphi %s1136_s26, %s1344_s26   ;;  %s1078_s25 = sphi %s1134_s25, %s1343_s25   ;;  %s1074_s24 = sphi %s1132_s24, %s1342_s24  }
   0x4   : > { %s1157_s30 = sadd.s32 1, %s1086_s27   ;;  %s179_s8 = sadd.s32 1, %s1082_s26 }
   0x5   : > { %s176_s9 = ssub.s32 %s1086_s27, %s1157_s30  ;;  %p189_p0 = scmp.ne.s32.totalorder %s1082_s26, %s1078_s25 }
   0x6   : > { %p177_p1 = scmp.eq.s32.totalorder %s176_s9, 0  ;;  %p190_p2 = scmp.eq.s32.totalorder %s1153_s28, 1 }
   0x7   : > { %p195_p3 = scmp.ne.s32.totalorder %s1078_s25, %s1074_s24  ;;  %p196_p4 = scmp.eq.s32.totalorder %s896_s29, 1 }
   0x8   : > { %s1168_s10 = scalar_select %p177_p1, %s1082_s26, %s179_s8  }
   0x9   : > { %p1170_p5 = por %p190_p2, %p189_p0  ;;  %p1174_p6 = por %p196_p4, %p195_p3 }
   0xa   : > { %p899_p7 = scmp.ge.s32.totalorder %s1086_s27, 1  ;;  %p249_p8 = scmp.lt.s32.totalorder %s1086_s27, 3 }
   0xc   : > { %p250_p9 = pnand %p899_p7, %p249_p8 }
   0xd   : > { %s1234_s19 = sshll.u32 (!%p250_p9), %s1153_s28, 1  ;;  %s282_s16 = sand.u32 (!%p250_p9), 1, %s1078_s25  }
   0xe   : > { %253 = sbr.rel (%p250_p9) target bundleno = 876 (0x36c), region = 48  ;;  %p290_p10 = scmp.lt.s32.totalorder (!%p250_p9), %s1234_s19, 2 }
   0xf   : > { %s900_s17 = sshll.u32 (!%p250_p9), %s282_s16, 2 }
  0x10   : > { %s284_s18 = scalar_lea.vmem (!%p250_p9), [#allocation2], %s900_s17 }
  0x13   : > { %v312_v0 = vld [vmem:[%s1334_s2 + $0x18] sm:$0xff]  ;;  %v1088_v2 = vmov 0   ;;  %v307_v3 = vld [vmem:[%s1333_s1 + $0x10] sm:$0xff]  ;;  %v1089_v4 = vmov 1   ;;  %v306_v5 = vld [vmem:[%s1333_s1 + $0x8] sm:$0xff]  ;;  %v1090_v14 = vmov 0.0   ;;  %v334_v20 = vlaneseq }
  0x14   : > { %v308_v1 = vld [vmem:[%s1333_s1 + $0x18] sm:$0xff]  ;;  %973 = vset.pattern.permute.xlu1 %v1088_v2  ;;  %972 = vset.pattern.permute.xlu0 %v1088_v2  ;;  %v311_v6 = vld [vmem:[%s1334_s2 + $0x10] sm:$0xff]  ;;  %v305_v7 = vld [vmem:[%s1333_s1] sm:$0xff]  ;;  %s291_s20 = scalar_select %p290_p10, %s1234_s19, 2  ;;  %vm474_vm0 = vcmask 261120  }
  0x15   : > { %377 = vperm.xlu1 %973, %v312_v0   ;;  %330 = vperm.xlu0 %972, %v308_v1   ;;  %v310_v8 = vld [vmem:[%s1334_s2 + $0x8] sm:$0xff]  ;;  %v309_v9 = vld [vmem:[%s1334_s2] sm:$0xff]  ;;  %v453_v10 = vld [vmem:[%s1336_s4 + $0x18] sm:$0xff]  ;;  %v335_v21 = vshrl.u32 %v334_v20, 7 }
  0x16   : > { %v451_v11 = vld [vmem:[%s1336_s4 + $0x8] sm:$0xff]  ;;  %v450_v12 = vld [vmem:[%s1336_s4] sm:$0xff]  ;;  %v913_v13 = vld [vmem:[%s1336_s4 + $0x30] sm:$0xff]  ;;  %551 = vmatprep.mubr.f32.mxu0 %v1090_v14  ;;  %690 = vmatprep.mubr.f32.mxu1 %v1090_v14  ;;  %s902_s21 = sshll.u32 %s291_s20, 1  ;;  %s1285_s20 = scalar_lea.sflag [#allocation3], %s282_s16 }
  0x17   : > { %v911_v15 = vld [vmem:[%s1336_s4 + $0x20] sm:$0xff]  ;;  %v452_v16 = vld [vmem:[%s1336_s4 + $0x10] sm:$0xff]  ;;  %v914_v17 = vld [vmem:[%s1336_s4 + $0x38] sm:$0xff]  ;;  %s293_s29 = scalar_lea.vmem %s1332_s0, %s902_s21  ;;  %v336_v22 = vsub.s32 0, %v335_v21  ;;  %v340_v23 = vsub.s32 2, %v335_v21  ;;  %v406_v27 = vsub.s32 1, %v335_v21 }
  0x18   : > { %v912_v18 = vld [vmem:[%s1336_s4 + $0x28] sm:$0xff]  ;;  %v724_v19 = vld [vmem:[%s1338_s6] sm:$0x3]  ;;  %v410_v28 = vsub.s32 3, %v335_v21  ;;  %s825_s21 = ssub.s32 (%p1170_p5), 3, %s1234_s19 }
  0x19   : > { %974 = vset.pattern.permute.xlu1 %v1089_v4  ;;  %325 = vperm.xlu0 %972, %v307_v3   ;;  %v304_v24 = vld [vmem:[%s293_s29] sm:$0xf]  ;;  %p826_p11 = scmp.lt.s32.totalorder (%p1170_p5), %s825_s21, 2 }
  0x1a   : > { %401 = vperm.xlu1 %974, %v308_v1   ;;  %v337_v25 = vrot.slane %v304_v24, %v336_v22  ;;  %v341_v26 = vrot.slane %v304_v24, %v340_v23  ;;  %v407_v31 = vrot.slane %v304_v24, %v406_v27  ;;  %v411_v32 = vrot.slane %v304_v24, %v410_v28  ;;  %v446_v24 = vld [vmem:[%s1335_s3] sm:$0xff] }
  0x1c   : > { %v347_v29 = vrot.slane %v337_v25, %v336_v22  ;;  %v351_v30 = vrot.slane %v341_v26, %v336_v22  ;;  %v417_v37 = vrot.slane %v407_v31, %v406_v27  ;;  %v421_v38 = vrot.slane %v411_v32, %v406_v27  ;;  %v447_v25 = vld [vmem:[%s1335_s3 + $0x8] sm:$0xff]  ;;  %v448_v26 = vld [vmem:[%s1335_s3 + $0x10] sm:$0xff]  ;;  %v449_v27 = vld [vmem:[%s1335_s3 + $0x18] sm:$0xff] }
  0x1d   : > { %320 = vperm.xlu0 %972, %v306_v5  }
  0x1e   : > { %975 = vset.pattern.permute.xlu1 %v1088_v2 }
  0x1f   : > { %372 = vperm.xlu1 %975, %v311_v6  }
  0x21   : > { %976 = vset.pattern.permute.xlu0 %v1089_v4 }
  0x22   : > { %397 = vperm.xlu0 %976, %v307_v3  }
  0x23   : > { %315 = vperm.xlu1 %975, %v305_v7  }
  0x26   : > { %393 = vperm.xlu0 %976, %v306_v5  }
  0x27   : > { %367 = vperm.xlu1 %975, %v310_v8  }
  0x2a   : > { %389 = vperm.xlu0 %976, %v305_v7  }
  0x2b   : > { %362 = vperm.xlu1 %975, %v309_v9  }
  0x2e   : > { %977 = vset.pattern.permute.xlu0 %v1088_v2 }
  0x2f   : > { %471 = vperm.xlu1 %975, %v453_v10   ;;  %466 = vperm.xlu0 %977, %v452_v16  }
  0x33   : > { %461 = vperm.xlu1 %975, %v451_v11   ;;  %611 = vperm.xlu0 %977, %v914_v17  }
  0x37   : > { %456 = vperm.xlu1 %975, %v450_v12   ;;  %601 = vperm.xlu0 %977, %v912_v18  }
  0x3b   : > { %606 = vperm.xlu1 %975, %v913_v13   ;;  %727 = vperm.xlu0 %977, %v724_v19  }
  0x3f   : > { %596 = vperm.xlu1 %975, %v911_v15  }
  0x90   : > { %v378_v33 = vpop.permute.xlu1 %377  ;;  %v331_v34 = vpop.permute.xlu0 %330 }
  0x91   : > { %v358_v35 = vmul.f32 %v347_v29, %v331_v34  ;;  %v359_v36 = vmul.f32 %v351_v30, %v331_v34 }
  0x93   : > { %v386_v41 = vadd.f32 %v378_v33, %v358_v35  ;;  %v387_v42 = vadd.f32 %v378_v33, %v359_v36 }
  0x94   : > { %v326_v39 = vpop.permute.xlu0 %325 }
  0x95   : > { %v402_v40 = vpop.permute.xlu1 %401  ;;  %v356_v49 = vmul.f32 %v347_v29, %v326_v39  ;;  %v357_v50 = vmul.f32 %v351_v30, %v326_v39 }
  0x96   : > { %v428_v43 = vmul.f32 %v417_v37, %v402_v40  ;;  %v429_v44 = vmul.f32 %v421_v38, %v402_v40 }
  0x98   : > { %v436_v45 = vadd.f32 %v428_v43, %v386_v41  ;;  %v321_v46 = vpop.permute.xlu0 %320  ;;  %v437_v47 = vadd.f32 %v429_v44, %v387_v42 }
  0x99   : > { %v354_v59 = vmul.f32 %v347_v29, %v321_v46  ;;  %v355_v60 = vmul.f32 %v351_v30, %v321_v46 }
  0x9a   : > { %978 = vtanh.f32 %v436_v45  ;;  %v373_v48 = vpop.permute.xlu1 %372 }
  0x9b   : > { %980 = vtanh.f32 %v437_v47  ;;  %v384_v52 = vadd.f32 %v373_v48, %v356_v49  ;;  %v385_v53 = vadd.f32 %v373_v48, %v357_v50 }
  0x9d   : > { %v398_v51 = vpop.permute.xlu0 %397 }
  0x9e   : > { %v426_v54 = vmul.f32 %v417_v37, %v398_v51  ;;  %v427_v55 = vmul.f32 %v421_v38, %v398_v51  ;;  %v316_v56 = vpop.permute.xlu1 %315 }
  0x9f   : > { %v352_v3 = vmul.f32 %v347_v29, %v316_v56  ;;  %v353_v4 = vmul.f32 %v351_v30, %v316_v56 }
  0xa0   : > { %v434_v57 = vadd.f32 %v426_v54, %v384_v52  ;;  %v435_v58 = vadd.f32 %v427_v55, %v385_v53  ;;  %v907_v55 = vld [vmem:[%s1335_s3 + $0x20] sm:$0xff] }
  0xa1   : > { %v394_v61 = vpop.permute.xlu0 %393 }
  0xa2   : > { %982 = vtanh.f32 %v434_v57  ;;  %v424_v62 = vmul.f32 %v417_v37, %v394_v61  ;;  %v425_v63 = vmul.f32 %v421_v38, %v394_v61  ;;  %v368_v0 = vpop.permute.xlu1 %367  ;;  %v908_v57 = vld [vmem:[%s1335_s3 + $0x28] sm:$0xff] }
  0xa3   : > { %984 = vtanh.f32 %v435_v58  ;;  %v382_v1 = vadd.f32 %v368_v0, %v354_v59  ;;  %v383_v2 = vadd.f32 %v368_v0, %v355_v60  ;;  %v909_v58 = vld [vmem:[%s1335_s3 + $0x30] sm:$0xff]  ;;  %v910_v59 = vld [vmem:[%s1335_s3 + $0x38] sm:$0xff] }
  0xa5   : > { %v432_v5 = vadd.f32 %v424_v62, %v382_v1  ;;  %v433_v6 = vadd.f32 %v425_v63, %v383_v2  ;;  %v390_v7 = vpop.permute.xlu0 %389 }
  0xa6   : > { %v422_v8 = vmul.f32 %v417_v37, %v390_v7  ;;  %v423_v9 = vmul.f32 %v421_v38, %v390_v7  ;;  %v363_v10 = vpop.permute.xlu1 %362 }
  0xa7   : > { %v979_v11 = vpop.eup %978  ;;  %986 = vtanh.f32 %v432_v5  ;;  %v380_v12 = vadd.f32 %v363_v10, %v352_v3  ;;  %v381_v13 = vadd.f32 %v363_v10, %v353_v4 }
  0xa8   : > { %v981_v15 = vpop.eup %980  ;;  %988 = vtanh.f32 %v433_v6 }
  0xa9   : > { %v430_v16 = vadd.f32 %v422_v8, %v380_v12  ;;  %v431_v17 = vadd.f32 %v423_v9, %v381_v13  ;;  %511 = vmatprep.subr.mxu0 %v981_v15 }
  0xaa   : > { %512 = vmatpush1.msra.mxu0 %v979_v11  ;;  %v472_v31 = vpop.permute.xlu1 %471  ;;  %v467_v37 = vpop.permute.xlu0 %466 }
  0xab   : > { %990 = vtanh.f32 %v430_v16 }
  0xac   : > { %992 = vtanh.f32 %v431_v17 }
  0xae   : > { %v462_v35 = vpop.permute.xlu1 %461  ;;  %v612_v1 = vpop.permute.xlu0 %611 }
  0xaf   : > { %v983_v18 = vpop.eup %982 }
  0xb0   : > { %v985_v19 = vpop.eup %984 }
  0xb1   : > { %513 = vmatprep.subr.mxu0 %v985_v19 }
  0xb2   : > { %514 = vmatpush1.msra.mxu0 %v983_v18  ;;  %v457_v44 = vpop.permute.xlu1 %456 }
  0xb4   : > { %v987_v20 = vpop.eup %986 }
  0xb5   : > { %v989_v21 = vpop.eup %988 }
  0xb6   : > { %515 = vmatprep.subr.mxu0 %v989_v21  ;;  %v607_v3 = vpop.permute.xlu1 %606 }
  0xb7   : > { %516 = vmatpush1.msra.mxu0 %v987_v20 }
  0xb8   : > { %v991_v22 = vpop.eup %990 }
  0xb9   : > { %v993_v23 = vpop.eup %992 }
  0xba   : > { %517 = vmatprep.subr.mxu0 %v993_v23  ;;  %v597_v11 = vpop.permute.xlu1 %596  ;;  %v723_v23 = vld [vmem:[%s1337_s5] sm:$0x3] }
  0xbb   : > { %518 = vmatpush1.msra.mxu0 %v991_v22 }
  0xbc   : > { %903 = vmatmul.mubr.msk.f32.vlgmr.msra.gmra.mxu0 %vm474_vm0, %v446_v24 }
  0xbd   : > { %557 = vmatprep.mubr.f32.mxu0 %v1090_v14 }
  0xc0   : > { %904 = vmatmul.mubr.msk.f32.gmra.mxu0 %vm474_vm0, %v447_v25 }
  0xc1   : > { %563 = vmatprep.mubr.f32.mxu0 %v1090_v14 }
  0xc4   : > { %905 = vmatmul.mubr.msk.f32.gmra.mxu0 %vm474_vm0, %v448_v26 }
  0xc5   : > { %569 = vmatprep.mubr.f32.mxu0 %v1090_v14 }
  0xc8   : > { %906 = vmatmul.mubr.msk.f32.gmra.mxu0 %vm474_vm0, %v449_v27 }
  0xc9   : > { %797 = vmatprep.mubr.f32.mxu0 %v1090_v14 }
 0x17c   : > { %v553_v28 = vpop.f32.mrf.mxu0 }
 0x17d   : > { %v554_v47 = vadd.f32 %v553_v28, %v457_v44 }
 0x17e   : > { %v555_v29 = vpop.f32.mrf.mxu0 }
 0x17f   : > { %v556_v46 = vadd.f32 %v555_v29, %v457_v44 }
 0x180   : > { %v559_v30 = vpop.f32.mrf.mxu0 }
 0x181   : > { %v560_v45 = vadd.f32 %v559_v30, %v462_v35 }
 0x182   : > { %v561_v32 = vpop.f32.mrf.mxu0 }
 0x183   : > { %v562_v43 = vadd.f32 %v561_v32, %v462_v35 }
 0x184   : > { %v565_v33 = vpop.f32.mrf.mxu0 }
 0x185   : > { %v566_v42 = vadd.f32 %v565_v33, %v467_v37 }
 0x186   : > { %v567_v34 = vpop.f32.mrf.mxu0 }
 0x187   : > { %v568_v40 = vadd.f32 %v567_v34, %v467_v37 }
 0x188   : > { %v571_v36 = vpop.f32.mrf.mxu0 }
 0x189   : > { %v572_v38 = vadd.f32 %v571_v36, %v472_v31 }
 0x18a   : > { %v573_v39 = vpop.f32.mrf.mxu0 }
 0x18b   : > { %v574_v41 = vadd.f32 %v573_v39, %v472_v31 }
 0x18d   : > { %994 = vtanh.f32 %v574_v41 }
 0x18e   : > { %996 = vtanh.f32 %v572_v38 }
 0x18f   : > { %998 = vtanh.f32 %v568_v40 }
 0x190   : > { %1000 = vtanh.f32 %v566_v42 }
 0x191   : > { %1002 = vtanh.f32 %v562_v43 }
 0x192   : > { %1004 = vtanh.f32 %v560_v45 }
 0x193   : > { %1006 = vtanh.f32 %v556_v46 }
 0x194   : > { %1008 = vtanh.f32 %v554_v47 }
 0x19a   : > { %v995_v48 = vpop.eup %994 }
 0x19b   : > { %v997_v49 = vpop.eup %996  ;;  %650 = vmatprep.subr.mxu1 %v995_v48 }
 0x19c   : > { %v999_v50 = vpop.eup %998  ;;  %651 = vmatpush1.msra.mxu1 %v997_v49 }
 0x19d   : > { %v1001_v51 = vpop.eup %1000  ;;  %652 = vmatprep.subr.mxu1 %v999_v50 }
 0x19e   : > { %v1003_v52 = vpop.eup %1002  ;;  %653 = vmatpush1.msra.mxu1 %v1001_v51 }
 0x19f   : > { %v1005_v53 = vpop.eup %1004  ;;  %654 = vmatprep.subr.mxu1 %v1003_v52 }
 0x1a0   : > { %v1007_v54 = vpop.eup %1006  ;;  %655 = vmatpush1.msra.mxu1 %v1005_v53 }
 0x1a1   : > { %v1009_v56 = vpop.eup %1008  ;;  %656 = vmatprep.subr.mxu1 %v1007_v54 }
 0x1a2   : > { %657 = vmatpush1.msra.mxu1 %v1009_v56 }
 0x1a3   : > { %915 = vmatmul.mubr.msk.f32.vlgmr.msra.gmra.mxu1 %vm474_vm0, %v907_v55 }
 0x1a4   : > { %696 = vmatprep.mubr.f32.mxu1 %v1090_v14 }
 0x1a7   : > { %916 = vmatmul.mubr.msk.f32.gmra.mxu1 %vm474_vm0, %v908_v57 }
 0x1a8   : > { %702 = vmatprep.mubr.f32.mxu1 %v1090_v14 }
 0x1ab   : > { %917 = vmatmul.mubr.msk.f32.gmra.mxu1 %vm474_vm0, %v909_v58 }
 0x1ac   : > { %708 = vmatprep.mubr.f32.mxu1 %v1090_v14  ;;  %v602_v14 = vpop.permute.xlu0 %601 }
 0x1af   : > { %918 = vmatmul.mubr.msk.f32.gmra.mxu1 %vm474_vm0, %v910_v59 }
 0x1b0   : > { %v728_v26 = vpop.permute.xlu0 %727 }
 0x263   : > { %v692_v60 = vpop.f32.mrf.mxu1 }
 0x264   : > { %v693_v15 = vadd.f32 %v692_v60, %v597_v11 }
 0x265   : > { %v694_v61 = vpop.f32.mrf.mxu1 }
 0x266   : > { %v695_v13 = vadd.f32 %v694_v61, %v597_v11 }
 0x267   : > { %v698_v62 = vpop.f32.mrf.mxu1 }
 0x268   : > { %v699_v12 = vadd.f32 %v698_v62, %v602_v14 }
 0x269   : > { %v700_v63 = vpop.f32.mrf.mxu1 }
 0x26a   : > { %v701_v10 = vadd.f32 %v700_v63, %v602_v14 }
 0x26b   : > { %v704_v0 = vpop.f32.mrf.mxu1 }
 0x26c   : > { %v705_v9 = vadd.f32 %v704_v0, %v607_v3 }
 0x26d   : > { %v706_v2 = vpop.f32.mrf.mxu1 }
 0x26e   : > { %v707_v7 = vadd.f32 %v706_v2, %v607_v3 }
 0x26f   : > { %v710_v4 = vpop.f32.mrf.mxu1 }
 0x270   : > { %v711_v5 = vadd.f32 %v710_v4, %v612_v1 }
 0x271   : > { %v712_v6 = vpop.f32.mrf.mxu1 }
 0x272   : > { %v713_v8 = vadd.f32 %v712_v6, %v612_v1 }
 0x274   : > { %1010 = vtanh.f32 %v713_v8 }
 0x275   : > { %1012 = vtanh.f32 %v711_v5 }
 0x276   : > { %1014 = vtanh.f32 %v707_v7 }
 0x277   : > { %1016 = vtanh.f32 %v705_v9 }
 0x278   : > { %1018 = vtanh.f32 %v701_v10 }
 0x279   : > { %1020 = vtanh.f32 %v699_v12 }
 0x27a   : > { %1022 = vtanh.f32 %v695_v13 }
 0x27b   : > { %1024 = vtanh.f32 %v693_v15 }
 0x281   : > { %v1011_v16 = vpop.eup %1010 }
 0x282   : > { %v1013_v17 = vpop.eup %1012  ;;  %757 = vmatprep.subr.mxu0 %v1011_v16 }
 0x283   : > { %v1015_v18 = vpop.eup %1014  ;;  %758 = vmatpush1.msra.mxu0 %v1013_v17 }
 0x284   : > { %v1017_v19 = vpop.eup %1016  ;;  %759 = vmatprep.subr.mxu0 %v1015_v18 }
 0x285   : > { %v1019_v20 = vpop.eup %1018  ;;  %760 = vmatpush1.msra.mxu0 %v1017_v19 }
 0x286   : > { %v1021_v21 = vpop.eup %1020  ;;  %761 = vmatprep.subr.mxu0 %v1019_v20 }
 0x287   : > { %v1023_v22 = vpop.eup %1022  ;;  %762 = vmatpush1.msra.mxu0 %v1021_v21 }
 0x288   : > { %v1025_v24 = vpop.eup %1024  ;;  %763 = vmatprep.subr.mxu0 %v1023_v22 }
 0x289   : > { %764 = vmatpush1.msra.mxu0 %v1025_v24 }
 0x28a   : > { %919 = vmatmul.mubr.msk.f32.vlgmr.msra.gmra.mxu0 %vm474_vm0, %v723_v23 }
 0x34a   : > { %v799_v25 = vpop.f32.mrf.mxu0 }
 0x34b   : > { %v800_v28 = vadd.f32 %v799_v25, %v728_v26 }
 0x34c   : > { %v801_v27 = vpop.f32.mrf.mxu0 }
 0x34d   : > { %v802_v29 = vadd.f32 %v801_v27, %v728_v26  ;;  %823 = sbr.rel (!%p1170_p5) target bundleno = 876 (0x36c), region = 52 }
 0x34f   : > { %v806_v30 = vcombine.low %v800_v28, %v802_v29 }
 0x351   : > { %920 = vst.sshfl [vmem:[%s284_s18] sm:$0x33 pattern:$0x76325410] %v806_v30 }
 0x352   : > { %s1347_s21 = smov (!%p826_p11, %s825_s21), 2 }
 0x353   : > { %s1290_s22 = sshll.u32 %s1347_s21, 5 }
 0x354   : > { %s830_s23 = ssub.s32 64, %s1290_s22 }
 0x355   : > { %831 = vsyncadd %s1285_s20, %s830_s23  ;;  %p924_p12 = scmp.ne.s32.totalorder %s1290_s22, 0  ;;  %s930_s29 = sshll.u32 %s1153_s28, 6 }
 0x356   : > { %s834_s11 = scalar_lea.hbm %s1339_s7, %s930_s29  ;;  %s837_s13 = sshll.u32 %s284_s18, 4  ;;  %s838_s13 = int_to_ptr.vmem [resolvable:$true] %s837_s13 }
 0x357   : > { %s1026_s19 = scalar_lea.vmem %s838_s13, %s1290_s22  ;;  %s1091_s14 = smov [#allocation2]  }
 0x358   : > { %p1027_p13 = scmp.ne.s32.totalorder %s838_s13, %s1026_s19  ;;  %s1030_s15 = sshll.u32 %s1091_s14, 4  ;;  %s1031_s15 = int_to_ptr.vmem [resolvable:$false] %s1030_s15 }
 0x359   : > { %s1032_s16 = scalar_lea.vmem %s1031_s15, 128  ;;  %p1033_p2 = scmp.lt.s32.totalorder %s838_s13, %s1031_s15 }
 0x35a   : > { %p1028_p0 = pnand %p1027_p13, %p924_p12  ;;  %p1034_p3 = scmp.lt.s32.totalorder %s1032_s16, %s1026_s19 }
 0x35c   : > { %p1029_p1 = pneg %p1028_p0  ;;  %p1035_p4 = por %p1034_p3, %p1033_p2 }
 0x35e   : > { %p1036_p5 = pnand %p1035_p4, %p1029_p1 }
 0x360   : > { %1039 = shalt.err (!%p1036_p5)
}
 0x361   : > { %s1040_s28 = scalar_lea.hbm %s834_s11, %s1290_s22  ;;  %s1044_s21 = scalar_lea.hbm %s1339_s7, 96 }
 0x362   : > { %p1041_p7 = scmp.ne.s32.totalorder %s834_s11, %s1040_s28  ;;  %p1045_p10 = scmp.lt.s32.totalorder %s834_s11, %s1339_s7 }
 0x363   : > { %p1046_p11 = scmp.lt.s32.totalorder %s1044_s21, %s1040_s28 }
 0x364   : > { %p1042_p8 = pnand %p1041_p7, %p924_p12 }
 0x365   : > { %p1047_p13 = por %p1046_p11, %p1045_p10 }
 0x366   : > { %p1043_p9 = pneg %p1042_p8 }
 0x368   : > { %p1048_p0 = pnand %p1047_p13, %p1043_p9 }
 0x36a   : > { %1051 = shalt.err (!%p1048_p0)
}
 0x36b   : > { %840 = dma.vmem_to_hbm [thread:$0]  (%p924_p12), %s838_s13, %s1290_s22, %s834_s11, %s1285_s20  }
 0x36c PF: > { %p936_p1 = scmp.ge.s32.totalorder %s1086_s27, 2  ;;  %s849_s8 = sand.u32 1, %s1074_s24  }
 0x36d   : > { %s850_s9 = scalar_lea.sflag [#allocation3], %s849_s8 }
 0x36e   : > { %p933_p2 = pnand %p936_p1, %p1174_p6 }
 0x370   : > { %p934_p3 = pneg %p933_p2 }
 0x372   : > { %1069 = dma.done.wait (%p934_p3), %s850_s9, 64  }
 0x373   : > { %1071 = vsyncadd (%p934_p3), %s850_s9, 4294967232  ;;  %p17_p4 = scmp.ge.s32.totalorder %s1157_s30, 4   ;;  %s1342_s24 = smov %s1078_s25 }
 0x374   : > { %s1343_s25 = smov %s1082_s26  ;;  %s1344_s26 = smov %s1168_s10 }
 0x375   : > { %s1345_s27 = smov %s1157_s30  ;;  %19 = sbr.rel (!%p17_p4) target bundleno = 3 (0x3), region = 85 }
 0x37a   :  { %855 = vsyncpa [#allocation3], 1 }
 0x37b   :  { %857 = vsyncpa [#allocation3 + $0x1], 1 }

</bundles_post_ra>
